<compile_context>
chip_gen: v7x
topology: tpu7x:2x2x1
jax: 0.10.0
libtpu: 0.0.40
codegen_flags: <defaults>
</compile_context>

<pallas_src>
import functools

import jax
import jax.numpy as jnp
from jax.experimental import pallas as pl
from jax.experimental.pallas import tpu as pltpu

D_IN, D_H1, D_H2, D_OUT = 512, 128, 10, 1
LANE = 128
EPS = 1e-5

COMPUTE_DTYPE = jnp.bfloat16   # x / weights / matmul operands
OUT_DTYPE = jnp.bfloat16       # lane-dense padded output slab


# -----------------------------------------------------------------------------
# Kernel
# -----------------------------------------------------------------------------
def modality_classifier_kernel(x_ref, w1_ref, b1_ref, w2_ref, b2_ref,
                               w3_ref, b3_ref, out_ref):
    f32 = jnp.float32
    cd = w1_ref.dtype
    # fc1 + bn1 (folded). bf16 x bf16 -> f32 accumulate on the MXU.
    h = jnp.dot(x_ref[...], w1_ref[...], preferred_element_type=f32) + b1_ref[...]
    h = jnp.maximum(h, 0.0)                                                # relu1
    # fc2 + bn2 (folded, zero-padded to 128 lanes).
    h = jnp.dot(h.astype(cd), w2_ref[...], preferred_element_type=f32) + b2_ref[...]
    h = jnp.maximum(h, 0.0)                                                # relu2
    # fc3 (zero-padded to 128 lanes; only column 0 is real).
    h = jnp.dot(h.astype(cd), w3_ref[...], preferred_element_type=f32) + b3_ref[...]
    out_ref[...] = jax.nn.sigmoid(h).astype(out_ref.dtype)                 # lane-dense store


# -----------------------------------------------------------------------------
# One-time weight preparation (BN fold + lane padding + dtype cast)
# -----------------------------------------------------------------------------
def _fold_bn(w, b, gamma, beta, mean, var, eps=EPS):
    """Fold eval-mode BatchNorm1d into the preceding Linear (w is (in, out))."""
    scale = gamma / jnp.sqrt(var + eps)
    shift = beta - mean * scale
    return w * scale[None, :], b * scale + shift


def _pad_last(a, n):
    pad = n - a.shape[-1]
    return jnp.pad(a, [(0, 0)] * (a.ndim - 1) + [(0, pad)])


def prepare_modality_classifier_weights(params):
    """Fold BN, pad narrow layers to 128 lanes, cast weights to bf16. Run once."""
    w1, b1 = _fold_bn(params["W1"], params["b1"], params["g1"], params["beta1"],
                      params["rm1"], params["rv1"])
    w2, b2 = _fold_bn(params["W2"], params["b2"], params["g2"], params["beta2"],
                      params["rm2"], params["rv2"])
    w2 = _pad_last(w2, LANE)                                   # (128, 128)
    b2 = _pad_last(b2, LANE)                                   # (128,)
    w3 = jnp.zeros((LANE, LANE), jnp.float32).at[:D_H2, :D_OUT].set(params["W3"])
    b3 = jnp.zeros((LANE,), jnp.float32).at[:D_OUT].set(params["b3"])
    prepared = dict(
        w1=w1.astype(COMPUTE_DTYPE), b1=b1.reshape(1, LANE).astype(jnp.float32),
        w2=w2.astype(COMPUTE_DTYPE), b2=b2.reshape(1, LANE).astype(jnp.float32),
        w3=w3.astype(COMPUTE_DTYPE), b3=b3.reshape(1, LANE).astype(jnp.float32),
    )
    return jax.tree_util.tree_map(jax.block_until_ready, prepared)


# -----------------------------------------------------------------------------
# Forward
# -----------------------------------------------------------------------------
@functools.partial(jax.jit, static_argnames=("block_rows",))
def modality_classifier_forward(prepared, x, *, block_rows=512):
    """x: (B, 512) -> (B,) sigmoid modality prediction (f32)."""
    B = x.shape[0]
    xc = x.astype(COMPUTE_DTYPE)
    args = (xc, prepared["w1"], prepared["b1"], prepared["w2"], prepared["b2"],
            prepared["w3"], prepared["b3"])
    out_shape = jax.ShapeDtypeStruct((B, LANE), OUT_DTYPE)

    if B <= block_rows:
        # Tiny batch: grid-less, everything VMEM-resident, no per-step overhead.
        vmem = pl.BlockSpec(memory_space=pltpu.MemorySpace.VMEM)
        out = pl.pallas_call(
            modality_classifier_kernel,
            out_shape=out_shape,
            in_specs=[vmem] * 7,
            out_specs=vmem,
        )(*args)
    else:
        # Batched: pipeline x/out over a 1-D batch grid, weights DMA'd once
        # (constant index_map) and shared across all grid steps / both cores.
        const2d = lambda shape: pl.BlockSpec(shape, lambda i: (0, 0))
        grid_spec = pltpu.PrefetchScalarGridSpec(
            num_scalar_prefetch=0,
            grid=(pl.cdiv(B, block_rows),),
            in_specs=[
                pl.BlockSpec((block_rows, D_IN), lambda i: (i, 0)),  # x
                const2d((D_IN, LANE)),                               # w1
                const2d((1, LANE)),                                  # b1
                const2d((LANE, LANE)),                               # w2
                const2d((1, LANE)),                                  # b2
                const2d((LANE, LANE)),                               # w3
                const2d((1, LANE)),                                  # b3
            ],
            out_specs=pl.BlockSpec((block_rows, LANE), lambda i: (i, 0)),
        )
        out = pl.pallas_call(
            modality_classifier_kernel,
            out_shape=out_shape,
            grid_spec=grid_spec,
            compiler_params=pltpu.CompilerParams(
                dimension_semantics=("parallel",)),
        )(*args)

    return out[:, 0].astype(jnp.float32)                        # squeeze(-1)


# -----------------------------------------------------------------------------
# Pure-JAX reference (f32, mirrors the PyTorch forward with eval-mode BN)
# -----------------------------------------------------------------------------
def modality_classifier_reference(params, x):
    hi = jax.lax.Precision.HIGHEST
    h = jnp.dot(x, params["W1"], precision=hi) + params["b1"]
    h = (h - params["rm1"]) / jnp.sqrt(params["rv1"] + EPS) * params["g1"] + params["beta1"]
    h = jnp.maximum(h, 0.0)
    h = jnp.dot(h, params["W2"], precision=hi) + params["b2"]
    h = (h - params["rm2"]) / jnp.sqrt(params["rv2"] + EPS) * params["g2"] + params["beta2"]
    h = jnp.maximum(h, 0.0)
    h = jnp.dot(h, params["W3"], precision=hi) + params["b3"]
    return jax.nn.sigmoid(h)[:, 0]


def init_params(key):
    """Deterministic synthetic parameters (PyTorch shapes, weights stored as (in, out))."""
    ks = jax.random.split(key, 14)
    p = {}
    p["W1"] = jax.random.normal(ks[0], (D_IN, D_H1), jnp.float32) * 0.05
    p["b1"] = jax.random.normal(ks[1], (D_H1,), jnp.float32) * 0.05
    p["g1"] = 1.0 + jax.random.normal(ks[2], (D_H1,), jnp.float32) * 0.1
    p["beta1"] = jax.random.normal(ks[3], (D_H1,), jnp.float32) * 0.1
    p["rm1"] = jax.random.normal(ks[4], (D_H1,), jnp.float32) * 0.1
    p["rv1"] = 0.5 + jax.random.uniform(ks[5], (D_H1,), jnp.float32)

    p["W2"] = jax.random.normal(ks[6], (D_H1, D_H2), jnp.float32) * 0.1
    p["b2"] = jax.random.normal(ks[7], (D_H2,), jnp.float32) * 0.05
    p["g2"] = 1.0 + jax.random.normal(ks[8], (D_H2,), jnp.float32) * 0.1
    p["beta2"] = jax.random.normal(ks[9], (D_H2,), jnp.float32) * 0.1
    p["rm2"] = jax.random.normal(ks[10], (D_H2,), jnp.float32) * 0.1
    p["rv2"] = 0.5 + jax.random.uniform(ks[11], (D_H2,), jnp.float32)

    p["W3"] = jax.random.normal(ks[12], (D_H2, D_OUT), jnp.float32) * 0.5
    p["b3"] = jax.random.normal(ks[13], (D_OUT,), jnp.float32) * 0.1
    return p


if __name__ == "__main__":
    key = jax.random.PRNGKey(0)
    pkey, xkey1, xkey2 = jax.random.split(key, 3)
    params = init_params(pkey)
    prepared = prepare_modality_classifier_weights(params)

    # bf16 inputs/weights (f32 accumulation) -> tolerance reflects bf16 rounding.
    TOL = 2e-2

    # 1) Tiny batch: grid-less path.
    x_small = jax.random.normal(xkey1, (8, D_IN), jnp.float32)
    out_small = modality_classifier_forward(prepared, x_small)
    jax.block_until_ready(out_small)
    ref_small = modality_classifier_reference(params, x_small)
    assert out_small.shape == (8,), out_small.shape
    err_small = float(jnp.max(jnp.abs(out_small - ref_small)))
    assert err_small < TOL, f"grid-less mismatch vs reference: {err_small}"

    # 2) Larger batch: pipelined / megacore-parallel gridded path (2 grid steps).
    x_big = jax.random.normal(xkey2, (256, D_IN), jnp.float32)
    out_big = modality_classifier_forward(prepared, x_big, block_rows=128)
    jax.block_until_ready(out_big)
    ref_big = modality_classifier_reference(params, x_big)
    assert out_big.shape == (256,), out_big.shape
    err_big = float(jnp.max(jnp.abs(out_big - ref_big)))
    assert err_big < TOL, f"gridded mismatch vs reference: {err_big}"

    print("KERNEL_OK")
</pallas_src>

<mosaic_0001>
module attributes {stable_mosaic.version = 11 : i64} {
  func.func @modality_classifier_kernel(%arg0: memref<8x512xbf16, #tpu.memory_space<vmem>>, %arg1: memref<512x128xbf16, #tpu.memory_space<vmem>>, %arg2: memref<1x128xf32, #tpu.memory_space<vmem>>, %arg3: memref<128x128xbf16, #tpu.memory_space<vmem>>, %arg4: memref<1x128xf32, #tpu.memory_space<vmem>>, %arg5: memref<128x128xbf16, #tpu.memory_space<vmem>>, %arg6: memref<1x128xf32, #tpu.memory_space<vmem>>, %arg7: memref<8x128xbf16, #tpu.memory_space<vmem>>) attributes {dimension_semantics = [], scalar_prefetch = 0 : i64, scratch_operands = 0 : i64, tpu.core_type = #tpu.core_type<tc>} {
    %c0 = arith.constant 0 : index
    %c0_0 = arith.constant 0 : index
    %0 = vector.load %arg0[%c0, %c0_0] : memref<8x512xbf16, #tpu.memory_space<vmem>>, vector<8x512xbf16>
    %c0_1 = arith.constant 0 : index
    %c0_2 = arith.constant 0 : index
    %1 = vector.load %arg1[%c0_1, %c0_2] : memref<512x128xbf16, #tpu.memory_space<vmem>>, vector<512x128xbf16>
    %cst = arith.constant dense<0.000000e+00> : vector<8x128xf32>
    %2 = tpu.matmul %0, %1, %cst {dimension_numbers = #tpu.dot_dimension_numbers<[1], [0], [0], [1], [0, 0, 1, 1], [], []>} : vector<8x512xbf16>, vector<512x128xbf16>, vector<8x128xf32> -> vector<8x128xf32>
    %c0_3 = arith.constant 0 : index
    %c0_4 = arith.constant 0 : index
    %3 = vector.load %arg2[%c0_3, %c0_4] : memref<1x128xf32, #tpu.memory_space<vmem>>, vector<1x128xf32>
    %4 = vector.broadcast %3 : vector<1x128xf32> to vector<8x128xf32>
    %5 = arith.addf %2, %4 : vector<8x128xf32>
    %cst_5 = arith.constant 0.000000e+00 : f32
    %6 = vector.broadcast %cst_5 : f32 to vector<8x128xf32>
    %7 = arith.maximumf %5, %6 : vector<8x128xf32>
    %8 = arith.truncf %7 : vector<8x128xf32> to vector<8x128xbf16>
    %c0_6 = arith.constant 0 : index
    %c0_7 = arith.constant 0 : index
    %9 = vector.load %arg3[%c0_6, %c0_7] : memref<128x128xbf16, #tpu.memory_space<vmem>>, vector<128x128xbf16>
    %cst_8 = arith.constant dense<0.000000e+00> : vector<8x128xf32>
    %10 = tpu.matmul %8, %9, %cst_8 {dimension_numbers = #tpu.dot_dimension_numbers<[1], [0], [0], [1], [0, 0, 1, 1], [], []>} : vector<8x128xbf16>, vector<128x128xbf16>, vector<8x128xf32> -> vector<8x128xf32>
    %c0_9 = arith.constant 0 : index
    %c0_10 = arith.constant 0 : index
    %11 = vector.load %arg4[%c0_9, %c0_10] : memref<1x128xf32, #tpu.memory_space<vmem>>, vector<1x128xf32>
    %12 = vector.broadcast %11 : vector<1x128xf32> to vector<8x128xf32>
    %13 = arith.addf %10, %12 : vector<8x128xf32>
    %cst_11 = arith.constant 0.000000e+00 : f32
    %14 = vector.broadcast %cst_11 : f32 to vector<8x128xf32>
    %15 = arith.maximumf %13, %14 : vector<8x128xf32>
    %16 = arith.truncf %15 : vector<8x128xf32> to vector<8x128xbf16>
    %c0_12 = arith.constant 0 : index
    %c0_13 = arith.constant 0 : index
    %17 = vector.load %arg5[%c0_12, %c0_13] : memref<128x128xbf16, #tpu.memory_space<vmem>>, vector<128x128xbf16>
    %cst_14 = arith.constant dense<0.000000e+00> : vector<8x128xf32>
    %18 = tpu.matmul %16, %17, %cst_14 {dimension_numbers = #tpu.dot_dimension_numbers<[1], [0], [0], [1], [0, 0, 1, 1], [], []>} : vector<8x128xbf16>, vector<128x128xbf16>, vector<8x128xf32> -> vector<8x128xf32>
    %c0_15 = arith.constant 0 : index
    %c0_16 = arith.constant 0 : index
    %19 = vector.load %arg6[%c0_15, %c0_16] : memref<1x128xf32, #tpu.memory_space<vmem>>, vector<1x128xf32>
    %20 = vector.broadcast %19 : vector<1x128xf32> to vector<8x128xf32>
    %21 = arith.addf %18, %20 : vector<8x128xf32>
    %22 = arith.negf %21 : vector<8x128xf32>
    %23 = math.exp %22 : vector<8x128xf32>
    %cst_17 = arith.constant 1.000000e+00 : f32
    %24 = vector.broadcast %cst_17 : f32 to vector<8x128xf32>
    %25 = arith.addf %24, %23 : vector<8x128xf32>
    %26 = arith.divf %24, %25 : vector<8x128xf32>
    %27 = arith.truncf %26 : vector<8x128xf32> to vector<8x128xbf16>
    %c0_18 = arith.constant 0 : index
    %c0_19 = arith.constant 0 : index
    %28 = vector.load %arg7[%c0_18, %c0_19] : memref<8x128xbf16, #tpu.memory_space<vmem>>, vector<8x128xbf16>
    tpu.vector_store %arg7[%c0_18, %c0_19], %27 {strides = array<i32>} : memref<8x128xbf16, #tpu.memory_space<vmem>>, vector<8x128xbf16>,
    return
  }
}

</mosaic_0001>

<bundles_post_ra>
// kernel: modality_classifier_forward.1
= control target key start
LH: loop header
LB: loop body
LE: loop exit
PB: predicated region body
PF: predicated region fallthrough
CT: control target
= control target key end

     0   :  { %12 = vsyncpa [#allocation3], 0  ;;  %s1103_s0 = inlined_call_operand.vmem [shape: bf16[8,512], index: 0, kind: input, shape index: {}]   ;;  %s1104_s1 = inlined_call_operand.hbm [shape: bf16[512,128], index: 1, kind: input, shape index: {}]   ;;  %s1105_s2 = inlined_call_operand.vmem [shape: f32[1,128], index: 2, kind: input, shape index: {}]   ;;  %s1106_s3 = inlined_call_operand.hbm [shape: bf16[128,128], index: 3, kind: input, shape index: {}]   ;;  %s1107_s4 = inlined_call_operand.vmem [shape: f32[1,128], index: 4, kind: input, shape index: {}]   ;;  %s1108_s5 = inlined_call_operand.vmem [shape: bf16[128,128], index: 5, kind: input, shape index: {}]   ;;  %s1109_s6 = inlined_call_operand.hbm [shape: f32[1,128], index: 6, kind: input, shape index: {}]   ;;  %s1110_s7 = inlined_call_operand.vmem [shape: bf16[8,128], index: 7, kind: output, shape index: {}]  }
   0x1   :  { %13 = vsyncpa [#allocation5], 0  ;;  %s956_s24 = smov [#allocation4]   ;;  %s957_s26 = smov [#allocation2]  }
   0x2   :  { %s35_s25 = sshll.u32 %s956_s24, 4  ;;  %s21_s27 = sshll.u32 %s957_s26, 4  ;;  %s36_s25 = int_to_ptr.vmem [resolvable:$true] %s35_s25  ;;  %s1003_s27 = int_to_ptr.vmem [resolvable:$true] %s21_s27 }
   0x3   :  { %s886_s30 = scalar_lea.hbm %s1106_s3, 1024 }
   0x4   :  { %p887_p0 = scmp.ne.s32.totalorder %s1106_s3, %s886_s30  ;;  %p890_p1 = scmp.lt.u32.totalorder %s886_s30, %s1106_s3 }
   0x6   :  { %p892_p2 = pnand %p890_p1, %p887_p0 }
   0x8   :  { %895 = shalt.err (!%p892_p2)
}
   0x9   :  { %s896_s12 = scalar_lea.vmem %s36_s25, 1024  ;;  %p901_p4 = scmp.lt.s32.totalorder %s36_s25, %s36_s25 }
   0xa   :  { %p897_p3 = scmp.ne.s32.totalorder %s36_s25, %s896_s12  ;;  %p902_p5 = scmp.lt.s32.totalorder %s896_s12, %s896_s12 }
   0xc   :  { %p903_p6 = por %p902_p5, %p901_p4 }
   0xe   :  { %p904_p7 = pnand %p903_p6, %p897_p3 }
  0x10   :  { %907 = shalt.err (!%p904_p7)
}
  0x11   :  { %s958_s13 = smov 64   ;;  %s959_s14 = smov 4  }
  0x12   :  { %41 = dma.hbm_to_vmem [thread:$0]  %s1106_s3, 1024, %s36_s25, [#allocation5], %s958_s13, %s958_s13, %s959_s14  }
  0x13   :  { %s908_s19 = scalar_lea.hbm %s1104_s1, 4096 }
  0x14   :  { %p909_p8 = scmp.ne.s32.totalorder %s1104_s1, %s908_s19  ;;  %p912_p9 = scmp.lt.u32.totalorder %s908_s19, %s1104_s1 }
  0x16   :  { %p914_p10 = pnand %p912_p9, %p909_p8 }
  0x18   :  { %917 = shalt.err (!%p914_p10)
}
  0x19   :  { %s918_s24 = scalar_lea.vmem %s1003_s27, 4096  ;;  %p923_p12 = scmp.lt.s32.totalorder %s1003_s27, %s1003_s27 }
  0x1a   :  { %p919_p11 = scmp.ne.s32.totalorder %s1003_s27, %s918_s24  ;;  %p924_p13 = scmp.lt.s32.totalorder %s918_s24, %s918_s24 }
  0x1c   :  { %p925_p0 = por %p924_p13, %p923_p12 }
  0x1e   :  { %p926_p1 = pnand %p925_p0, %p919_p11 }
  0x20   :  { %929 = shalt.err (!%p926_p1)
}
  0x21   :  { %27 = dma.hbm_to_vmem [thread:$0]  %s1104_s1, 4096, %s1003_s27, [#allocation3], %s958_s13, %s958_s13, %s959_s14  }
  0x22   :  { %s960_s26 = smov [#allocation6]   ;;  %s930_s8 = scalar_lea.hbm %s1109_s6, 16 }
  0x23   :  { %s52_s28 = sshll.u32 %s960_s26, 4  ;;  %p931_p2 = scmp.ne.s32.totalorder %s1109_s6, %s930_s8  ;;  %s53_s28 = int_to_ptr.vmem [resolvable:$true] %s52_s28 }
  0x24   :  { %p934_p3 = scmp.lt.u32.totalorder %s930_s8, %s1109_s6 }
  0x26   :  { %p936_p4 = pnand %p934_p3, %p931_p2 }
  0x28   :  { %939 = shalt.err (!%p936_p4)
}
  0x29   :  { %s940_s15 = scalar_lea.vmem %s53_s28, 16  ;;  %s944_s1 = scalar_lea.vmem %s53_s28, 32 }
  0x2a   :  { %p941_p5 = scmp.ne.s32.totalorder %s53_s28, %s940_s15  ;;  %p945_p6 = scmp.lt.s32.totalorder %s53_s28, %s53_s28 }
  0x2b   :  { %p946_p7 = scmp.lt.s32.totalorder %s944_s1, %s940_s15 }
  0x2d   :  { %p947_p8 = por %p946_p7, %p945_p6 }
  0x2f   :  { %p948_p9 = pnand %p947_p8, %p941_p5 }
  0x31   :  { %951 = shalt.err (!%p948_p9)
}
  0x32   :  { %55 = dma.hbm_to_vmem [thread:$0]  %s1109_s6, 16, %s53_s28, [#allocation5]  }
  0x33   :  { %952 = dma.done.wait [#allocation3], 4096  }
  0x34   :  { %953 = vsyncadd [#allocation3], 4294963200 }
  0x35   :  { %954 = dma.done.wait [#allocation5], 1040  }
  0x36   :  { %955 = vsyncadd [#allocation5], 4294966256  ;;  %v830_v0 = vld [vmem:[#allocation2 + $0x40] sm:$0xff]   ;;  %v834_v4 = vld [vmem:[#allocation2 + $0x48] sm:$0xff]   ;;  %v961_v39 = vmov 0.0   ;;  %vm962_vm0 = vmmov 0  }
  0x37   :  { %v831_v1 = vld [vmem:[#allocation2 + $0xc0] sm:$0xff]   ;;  %721 = vmatprep.subr.bf16.mxu0 %v830_v0  ;;  %v835_v5 = vld [vmem:[#allocation2 + $0xc8] sm:$0xff]   ;;  %v838_v8 = vld [vmem:[#allocation2 + $0x50] sm:$0xff]  }
  0x38   :  { %v832_v2 = vld [vmem:[#allocation2] sm:$0xff]   ;;  %743 = vmatprep.subr.bf16.mxu1 %v831_v1  ;;  %v836_v6 = vld [vmem:[#allocation2 + $0x8] sm:$0xff]   ;;  %v839_v9 = vld [vmem:[#allocation2 + $0xd0] sm:$0xff]  }
  0x39   :  { %v833_v3 = vld [vmem:[#allocation2 + $0x80] sm:$0xff]   ;;  %722 = vmatpush3.bf16.msra.mxu0 %v832_v2  ;;  %v837_v7 = vld [vmem:[#allocation2 + $0x88] sm:$0xff]   ;;  %v840_v10 = vld [vmem:[#allocation2 + $0x10] sm:$0xff]  }
  0x3a   :  { %744 = vmatpush3.bf16.msra.mxu1 %v833_v3  ;;  %723 = vmatprep.subr.bf16.mxu0 %v834_v4  ;;  %v841_v11 = vld [vmem:[#allocation2 + $0x90] sm:$0xff]   ;;  %v842_v12 = vld [vmem:[#allocation2 + $0x58] sm:$0xff]   ;;  %v846_v16 = vld [vmem:[#allocation2 + $0x60] sm:$0xff]  }
  0x3b   :  { %745 = vmatprep.subr.bf16.mxu1 %v835_v5  ;;  %v843_v13 = vld [vmem:[#allocation2 + $0xd8] sm:$0xff]   ;;  %v847_v17 = vld [vmem:[#allocation2 + $0xe0] sm:$0xff]   ;;  %v850_v20 = vld [vmem:[#allocation2 + $0x68] sm:$0xff]  }
  0x3c   :  { %v844_v14 = vld [vmem:[#allocation2 + $0x18] sm:$0xff]   ;;  %v848_v18 = vld [vmem:[#allocation2 + $0x20] sm:$0xff]   ;;  %v851_v21 = vld [vmem:[#allocation2 + $0xe8] sm:$0xff]  }
  0x3d   :  { %724 = vmatpush3.bf16.msra.mxu0 %v836_v6  ;;  %v845_v15 = vld [vmem:[#allocation2 + $0x98] sm:$0xff]   ;;  %v849_v19 = vld [vmem:[#allocation2 + $0xa0] sm:$0xff]   ;;  %v852_v22 = vld [vmem:[#allocation2 + $0x28] sm:$0xff]  }
  0x3e   :  { %746 = vmatpush3.bf16.msra.mxu1 %v837_v7  ;;  %725 = vmatprep.subr.bf16.mxu0 %v838_v8  ;;  %v853_v23 = vld [vmem:[#allocation2 + $0xa8] sm:$0xff]   ;;  %v854_v24 = vld [vmem:[#allocation2 + $0x70] sm:$0xff]   ;;  %v858_v28 = vld [vmem:[#allocation2 + $0x78] sm:$0xff]  }
  0x3f   :  { %747 = vmatprep.subr.bf16.mxu1 %v839_v9  ;;  %v855_v25 = vld [vmem:[#allocation2 + $0xf0] sm:$0xff]   ;;  %v859_v29 = vld [vmem:[#allocation2 + $0xf8] sm:$0xff]   ;;  %v66_v32 = vld [vmem:[%s1103_s0] sm:$0xff] }
  0x40   :  { %v856_v26 = vld [vmem:[#allocation2 + $0x30] sm:$0xff]   ;;  %v860_v30 = vld [vmem:[#allocation2 + $0x38] sm:$0xff]   ;;  %v67_v33 = vld [vmem:[%s1103_s0 + $0x8] sm:$0xff]  ;;  %v666_v34 = vcombine.low %v66_v32, %v66_v32  ;;  %v667_v35 = vcombine.high %v66_v32, %v66_v32 }
  0x41   :  { %726 = vmatpush3.bf16.msra.mxu0 %v840_v10  ;;  %v857_v27 = vld [vmem:[#allocation2 + $0xb0] sm:$0xff]   ;;  %v861_v31 = vld [vmem:[#allocation2 + $0xb8] sm:$0xff]   ;;  %v668_v36 = vcombine.low %v67_v33, %v67_v33  ;;  %v669_v37 = vcombine.high %v67_v33, %v67_v33  ;;  %v866_v38 = vld [vmem:[#allocation4] sm:$0xff]  }
  0x42   :  { %748 = vmatpush3.bf16.msra.mxu1 %v841_v11  ;;  %727 = vmatprep.subr.bf16.mxu0 %v842_v12  ;;  %v867_v40 = vld [vmem:[#allocation4 + $0x8] sm:$0xff]   ;;  %v868_v41 = vld [vmem:[#allocation4 + $0x10] sm:$0xff]   ;;  %v869_v42 = vld [vmem:[#allocation4 + $0x18] sm:$0xff]  }
  0x43   :  { %749 = vmatprep.subr.bf16.mxu1 %v843_v13  ;;  %377 = vmatprep.mubr.bf16.mxu0 %v667_v35  ;;  %v870_v43 = vld [vmem:[#allocation4 + $0x20] sm:$0xff]   ;;  %v871_v44 = vld [vmem:[#allocation4 + $0x28] sm:$0xff]   ;;  %v872_v45 = vld [vmem:[#allocation4 + $0x30] sm:$0xff]  }
  0x44   :  { %417 = vmatprep.mubr.bf16.mxu1 %v669_v37  ;;  %v873_v46 = vld [vmem:[#allocation4 + $0x38] sm:$0xff]   ;;  %v874_v47 = vld [vmem:[%s1108_s5] sm:$0xff]   ;;  %v875_v48 = vld [vmem:[%s1108_s5 + $0x8] sm:$0xff]  }
  0x45   :  { %728 = vmatpush3.bf16.msra.mxu0 %v844_v14  ;;  %v876_v49 = vld [vmem:[%s1108_s5 + $0x10] sm:$0xff]   ;;  %v877_v50 = vld [vmem:[%s1108_s5 + $0x18] sm:$0xff]   ;;  %v878_v51 = vld [vmem:[%s1108_s5 + $0x20] sm:$0xff]  }
  0x46   :  { %750 = vmatpush3.bf16.msra.mxu1 %v845_v15  ;;  %729 = vmatprep.subr.bf16.mxu0 %v846_v16  ;;  %v879_v52 = vld [vmem:[%s1108_s5 + $0x28] sm:$0xff]   ;;  %v665_v55 = vld [vmem:[%s1105_s2] ss:$0 sm:$0xff]  ;;  %v880_v4 = vld [vmem:[%s1108_s5 + $0x30] sm:$0xff]  }
  0x47   :  { %751 = vmatprep.subr.bf16.mxu1 %v847_v17  ;;  %v881_v5 = vld [vmem:[%s1108_s5 + $0x38] sm:$0xff]   ;;  %v702_v6 = vld [vmem:[%s1107_s4] ss:$0 sm:$0xff] }
  0x48   :  { %v711_v14 = vld [vmem:[#allocation6] ss:$0 sm:$0xff] }
  0x49   :  { %730 = vmatpush3.bf16.msra.mxu0 %v848_v18 }
  0x4a   :  { %752 = vmatpush3.bf16.msra.mxu1 %v849_v19  ;;  %731 = vmatprep.subr.bf16.mxu0 %v850_v20 }
  0x4b   :  { %753 = vmatprep.subr.bf16.mxu1 %v851_v21 }
  0x4d   :  { %732 = vmatpush3.bf16.msra.mxu0 %v852_v22 }
  0x4e   :  { %754 = vmatpush3.bf16.msra.mxu1 %v853_v23  ;;  %733 = vmatprep.subr.bf16.mxu0 %v854_v24 }
  0x4f   :  { %755 = vmatprep.subr.bf16.mxu1 %v855_v25 }
  0x51   :  { %734 = vmatpush3.bf16.msra.mxu0 %v856_v26 }
  0x52   :  { %756 = vmatpush3.bf16.msra.mxu1 %v857_v27  ;;  %735 = vmatprep.subr.bf16.mxu0 %v858_v28 }
  0x53   :  { %757 = vmatprep.subr.bf16.mxu1 %v859_v29 }
  0x55   :  { %736 = vmatpush3.bf16.msra.mxu0 %v860_v30 }
  0x56   :  { %758 = vmatpush3.bf16.msra.mxu1 %v861_v31  ;;  %783 = vmatprep.subr.bf16.mxu0 %v961_v39 }
  0x57   :  { %803 = vmatprep.subr.bf16.mxu1 %v961_v39 }
  0x58   :  { %378 = vmatmul.mubr.bf16.vlgmr.msra.gmra.mrb[0].mxu0 %v666_v34 }
  0x59   :  { %418 = vmatmul.mubr.bf16.vlgmr.msra.gmra.mrb[0].mxu1 %v668_v36  ;;  %784 = vmatpush3.bf16.msra.mxu0 %v866_v38 }
  0x5a   :  { %785 = vmatprep.subr.bf16.mxu0 %v961_v39  ;;  %799 = vmatprep.mubr.msk.bf16.mxu0 %vm962_vm0, %v961_v39 }
  0x5b   :  { %819 = vmatprep.mubr.msk.bf16.mxu1 %vm962_vm0, %v961_v39  ;;  %804 = vmatpush3.bf16.msra.mxu1 %v874_v47 }
  0x5c   :  { %805 = vmatprep.subr.bf16.mxu1 %v961_v39 }
  0x5d   :  { %786 = vmatpush3.bf16.msra.mxu0 %v867_v40 }
  0x5e   :  { %787 = vmatprep.subr.bf16.mxu0 %v961_v39 }
  0x5f   :  { %806 = vmatpush3.bf16.msra.mxu1 %v875_v48 }
  0x60   :  { %807 = vmatprep.subr.bf16.mxu1 %v961_v39 }
  0x61   :  { %788 = vmatpush3.bf16.msra.mxu0 %v868_v41 }
  0x62   :  { %789 = vmatprep.subr.bf16.mxu0 %v961_v39 }
  0x63   :  { %808 = vmatpush3.bf16.msra.mxu1 %v876_v49 }
  0x64   :  { %809 = vmatprep.subr.bf16.mxu1 %v961_v39 }
  0x65   :  { %790 = vmatpush3.bf16.msra.mxu0 %v869_v42 }
  0x66   :  { %791 = vmatprep.subr.bf16.mxu0 %v961_v39 }
  0x67   :  { %810 = vmatpush3.bf16.msra.mxu1 %v877_v50 }
  0x68   :  { %811 = vmatprep.subr.bf16.mxu1 %v961_v39 }
  0x69   :  { %792 = vmatpush3.bf16.msra.mxu0 %v870_v43 }
  0x6a   :  { %793 = vmatprep.subr.bf16.mxu0 %v961_v39 }
  0x6b   :  { %812 = vmatpush3.bf16.msra.mxu1 %v878_v51 }
  0x6c   :  { %813 = vmatprep.subr.bf16.mxu1 %v961_v39 }
  0x6d   :  { %794 = vmatpush3.bf16.msra.mxu0 %v871_v44 }
  0x6e   :  { %795 = vmatprep.subr.bf16.mxu0 %v961_v39 }
  0x6f   :  { %814 = vmatpush3.bf16.msra.mxu1 %v879_v52 }
  0x70   :  { %815 = vmatprep.subr.bf16.mxu1 %v961_v39 }
  0x71   :  { %796 = vmatpush3.bf16.msra.mxu0 %v872_v45 }
  0x72   :  { %797 = vmatprep.subr.bf16.mxu0 %v961_v39 }
  0x73   :  { %816 = vmatpush3.bf16.msra.mxu1 %v880_v4 }
  0x74   :  { %817 = vmatprep.subr.bf16.mxu1 %v961_v39 }
  0x75   :  { %798 = vmatpush3.bf16.msra.mxu0 %v873_v46 }
  0x77   :  { %818 = vmatpush3.bf16.msra.mxu1 %v881_v5 }
 0x12b   :  { %v737_v53 = vpop.f32.mrb[0].mxu0 }
 0x12c   :  { %v759_v54 = vpop.f32.mrb[0].mxu1  ;;  %v738_v56 = vpop.f32.mrb[1].mxu0 }
 0x12d   :  { %v760_v57 = vpop.f32.mrb[1].mxu1  ;;  %v739_v58 = vadd.f32 %v738_v56, %v737_v53  ;;  %v740_v60 = vpop.f32.mrb[2].mxu0 }
 0x12e   :  { %v761_v59 = vadd.f32 %v760_v57, %v759_v54  ;;  %v762_v61 = vpop.f32.mrb[2].mxu1  ;;  %v741_v62 = vpop.f32.mrb[3].mxu0 }
 0x12f   :  { %v763_v63 = vpop.f32.mrb[3].mxu1  ;;  %v380_v0 = vadd.f32 %v739_v58, %v665_v55 }
 0x131   :  { %v420_v1 = vadd.f32 %v761_v59, %v380_v0 }
 0x133   :  { %v425_v2 = vmax.f32 %v420_v1, 0.0 }
 0x135   :  { %v426_v3 = vpack.c.bf16 %v425_v2, %v425_v2 }
 0x137   :  { %800 = vmatmul.mubr.bf16.vlgmr.msra.gmra.mrb[4].mxu0 %v426_v3 }
 0x20a   :  { %v532_v7 = vpop.f32.mrb[4].mxu0 }
 0x20b   :  { %v533_v8 = vadd.f32 %v702_v6, %v532_v7  ;;  %v801_v9 = vpop.f32.mrb[5].mxu0 }
 0x20c   :  { %v535_v10 = vpop.f32.mrb[6].mxu0 }
 0x20d   :  { %v538_v11 = vmax.f32 %v533_v8, 0.0  ;;  %v802_v12 = vpop.f32.mrb[7].mxu0 }
 0x20f   :  { %v539_v13 = vpack.c.bf16 %v538_v11, %v538_v11 }
 0x211   :  { %820 = vmatmul.mubr.bf16.vlgmr.msra.gmra.mrb[4].mxu1 %v539_v13 }
 0x2e4   :  { %v645_v15 = vpop.f32.mrb[4].mxu1 }
 0x2e5   :  { %v646_v16 = vadd.f32 %v711_v14, %v645_v15  ;;  %v821_v17 = vpop.f32.mrb[5].mxu1 }
 0x2e6   :  { %v648_v18 = vpop.f32.mrb[6].mxu1 }
 0x2e7   :  { %v720_v19 = vmul.f32 -1.442695, %v646_v16  ;;  %v822_v20 = vpop.f32.mrb[7].mxu1 }
 0x2e9   :  { %882 = vpow2.f32 %v720_v19 }
 0x2f3   :  { %v883_v21 = vpop.eup %882 }
 0x2f4   :  { %v654_v22 = vadd.f32 1.0, %v883_v21 }
 0x2f6   :  { %884 = vrcp.f32 %v654_v22 }
 0x300   :  { %v885_v23 = vpop.eup %884 }
 0x301   :  { %v657_v24 = vpack.c.bf16 %v885_v23, %v885_v23 }
 0x303   :  { %658 = vst [vmem:[%s1110_s7] sm:$0xf] %v657_v24 }
 0x304   :  { %663 = vsyncpa [#allocation3], 1 }
 0x305   :  { %664 = vsyncpa [#allocation5], 1 }

</bundles_post_ra>
